<compile_context>
chip_gen: v7x
topology: tpu7x:2x2x1
jax: 0.10.0
libtpu: 0.0.40
codegen_flags: <defaults>
</compile_context>

<pallas_src>
import jax
import jax.numpy as jnp
from jax.experimental import pallas as pl
from jax.experimental.pallas import tpu as pltpu


def _round_down_multiple(n, m):
    return (n // m) * m


def _round_up_multiple(n, m):
    return ((n + m - 1) // m) * m


def _vmem_budget_bytes():
    """3/4 of physical VMEM, capped at 96 MiB; 48 MiB (v7x-sized) fallback."""
    phys = 64 << 20
    try:
        info = pltpu.get_tpu_info()
        phys = int(getattr(info, "vmem_capacity_bytes", phys))
    except Exception:
        pass
    return int(min(phys * 3 // 4, 96 << 20))


def _choose_tiling(B, C, HW, x_itemsize, fixed_bytes, budget,
                   target_payload=4 << 20):
    """Pick (Bt, ts): batch-block and spatial-tile sizes.

    Per-step VMEM model: x and out tiles double-buffered (4 copies of the
    Bt*C*ts slab) plus the resident weight/bias (`fixed_bytes`).
    """
    def vmem(bt, ts):
        return 4 * bt * C * ts * x_itemsize + fixed_bytes

    # Whole problem in one grid step if it fits (kills all per-step overhead).
    if vmem(B, HW) <= budget:
        return B, HW

    per_col = C * x_itemsize                                     # x bytes per lane column
    max_cols = max(1, (budget - fixed_bytes) // (4 * per_col))   # cols that fit at Bt=1

    if HW <= max_cols:
        ts = HW                                  # full spatial extent per image
    elif HW % 128 == 0:
        # Lane-dense 128-multiple tile: capped by budget, full extent, and the
        # payload target (bigger buys nothing once DMA dominates overhead).
        want = _round_up_multiple(max(target_payload // per_col, 512), 128)
        ts = max(128, min(_round_down_multiple(max_cols, 128), HW, want))
    else:
        # Ragged spatial extent too big for one block: lane-dense 128-multiple
        # tiles; Pallas masks the partial last block (op is pointwise in lanes).
        ts = max(128, _round_down_multiple(max_cols, 128))

    # Block over batch if a single image's spatial slab is still a small payload.
    bt = 1
    if ts >= HW:
        per_img = C * HW * x_itemsize
        bt = int(min(B, max(1, target_payload // max(per_img, 1))))
        while bt > 1 and vmem(bt, HW) > budget:
            bt -= 1
    return bt, ts


def _dresidual_kernel(x_ref, w_ref, b_ref, o_ref):
    # x_ref / o_ref : (Bt, C, ts)  channels on sublanes, spatial on lanes
    # w_ref         : (C, C)       resident across all grid steps
    # b_ref         : (C, 1)       resident across all grid steps
    w = w_ref[...]
    bcol = b_ref[...].astype(jnp.float32)              # (C, 1) broadcasts over lanes
    for i in range(x_ref.shape[0]):                    # static unroll over Bt images
        x = x_ref[i]                                   # (C, ts)
        y = jnp.dot(w, x.astype(w.dtype), preferred_element_type=jnp.float32)
        o_ref[i] = (y + bcol + x.astype(jnp.float32)).astype(o_ref.dtype)


def dresidual_pallas(x_nchw, weight, bias, *, matmul_dtype=None,
                     target_payload_bytes=4 << 20):
    """Compute fn(x) + x with fn = pointwise (1x1-conv) channel mixing.

    x_nchw : (B, C, H, W)
    weight : (C, C)   (PyTorch Linear / 1x1-conv layout, C_out == C_in)
    bias   : (C,)
    matmul_dtype : optional dtype for the MXU matmul only (e.g. jnp.bfloat16 on
                   v5e with large C); accumulation and the residual stay f32.
    returns (B, C, H, W) in the same NCHW layout, no transposes anywhere.
    """
    B, C, H, W = x_nchw.shape
    HW = H * W
    assert weight.shape == (C, C) and bias.shape == (C,)

    w = weight.astype(matmul_dtype) if matmul_dtype is not None else weight

    x3 = x_nchw.reshape(B, C, HW)          # free reshape: spatial axis -> lanes
    b2 = bias.reshape(C, 1)

    x_itemsize = jnp.dtype(x3.dtype).itemsize
    w_bytes = C * C * jnp.dtype(w.dtype).itemsize
    bias_bytes = C * jnp.dtype(b2.dtype).itemsize

    budget = _vmem_budget_bytes()

    # W / bias have a constant block index -> never re-fetched; extra buffers
    # are pure VMEM waste.  Single-buffer them when they are big enough to
    # matter (pure VMEM recovery on v7x, neutral elsewhere).
    single_buffer_params = w_bytes >= (1 << 20)
    param_copies = 1 if single_buffer_params else 2
    fixed_bytes = param_copies * (w_bytes + bias_bytes)

    Bt, ts = _choose_tiling(B, C, HW, x_itemsize, fixed_bytes, budget,
                            target_payload=target_payload_bytes)
    grid = (pl.cdiv(B, Bt), pl.cdiv(HW, ts))

    def x_map(b, s):
        return (b, 0, s)

    def p_map(b, s):
        return (0, 0)

    if single_buffer_params:
        w_spec = pl.BlockSpec((C, C), p_map, pipeline_mode=pl.Buffered(1))
        b_spec = pl.BlockSpec((C, 1), p_map, pipeline_mode=pl.Buffered(1))
    else:
        w_spec = pl.BlockSpec((C, C), p_map)
        b_spec = pl.BlockSpec((C, 1), p_map)

    cost = pl.CostEstimate(
        flops=2 * B * HW * C * C,
        transcendentals=0,
        bytes_accessed=(2 * B * C * HW * x_itemsize + w_bytes + bias_bytes),
    )

    out3 = pl.pallas_call(
        _dresidual_kernel,
        out_shape=jax.ShapeDtypeStruct((B, C, HW), x3.dtype),
        grid_spec=pltpu.PrefetchScalarGridSpec(
            num_scalar_prefetch=0,
            grid=grid,
            in_specs=[
                pl.BlockSpec((Bt, C, ts), x_map),   # x tile
                w_spec,                             # resident weight
                b_spec,                             # resident bias
            ],
            out_specs=pl.BlockSpec((Bt, C, ts), x_map),
        ),
        compiler_params=pltpu.CompilerParams(
            dimension_semantics=("parallel", "parallel"),
            vmem_limit_bytes=int(budget),
        ),
        cost_estimate=cost,
    )(x3, w, b2)

    return out3.reshape(B, C, H, W)


if __name__ == "__main__":
    key = jax.random.PRNGKey(0)
    kx, kw, kb = jax.random.split(key, 3)

    B, C, H, W = 2, 32, 16, 16
    x = jax.random.normal(kx, (B, C, H, W), dtype=jnp.float32)
    # deterministic parameter init (synthetic, not loaded from checkpoint)
    weight = jax.random.normal(kw, (C, C), dtype=jnp.float32) * 0.05
    bias = jax.random.normal(kb, (C,), dtype=jnp.float32) * 0.01

    out = dresidual_pallas(x, weight, bias)
    out = jax.block_until_ready(out)

    # reference: fn(x) + x with fn = pointwise 1x1-conv channel mixing (NCHW)
    ref = jnp.einsum("oc,bchw->bohw", weight, x) + bias[None, :, None, None] + x
    assert jnp.allclose(out, ref, atol=1e-4, rtol=1e-4), "mismatch vs reference"

    print("KERNEL_OK")
</pallas_src>

<mosaic_0001>
module attributes {stable_mosaic.version = 11 : i64} {
  func.func @_dresidual_kernel(%arg0: i32, %arg1: i32, %arg2: memref<2x32x256xf32, #tpu.memory_space<vmem>>, %arg3: memref<32x32xf32, #tpu.memory_space<vmem>>, %arg4: memref<32x1xf32, #tpu.memory_space<vmem>>, %arg5: memref<2x32x256xf32, #tpu.memory_space<vmem>>) attributes {dimension_semantics = [#tpu.dimension_semantics<parallel>, #tpu.dimension_semantics<parallel>], iteration_bounds = array<i64: 1, 1>, scalar_prefetch = 0 : i64, scratch_operands = 0 : i64, tpu.core_type = #tpu.core_type<tc>, window_params = [{transform_indices = @transform_0, window_bounds = array<i64: 2, 32, 256>}, {pipeline_mode = #tpu.pipeline_mode<synchronous>, transform_indices = @transform_1, window_bounds = array<i64: 32, 32>}, {pipeline_mode = #tpu.pipeline_mode<synchronous>, transform_indices = @transform_2, window_bounds = array<i64: 32, 1>}, {transform_indices = @transform_3, window_bounds = array<i64: 2, 32, 256>}]} {
    %c0 = arith.constant 0 : index
    %c0_0 = arith.constant 0 : index
    %0 = vector.load %arg3[%c0, %c0_0] : memref<32x32xf32, #tpu.memory_space<vmem>>, vector<32x32xf32>
    %c0_1 = arith.constant 0 : index
    %c0_2 = arith.constant 0 : index
    %1 = vector.load %arg4[%c0_1, %c0_2] : memref<32x1xf32, #tpu.memory_space<vmem>>, vector<32x1xf32>
    %c0_3 = arith.constant 0 : index
    %c0_4 = arith.constant 0 : index
    %c0_5 = arith.constant 0 : index
    %2 = vector.load %arg2[%c0_3, %c0_4, %c0_5] : memref<2x32x256xf32, #tpu.memory_space<vmem>>, vector<1x32x256xf32>
    %3 = vector.shape_cast %2 : vector<1x32x256xf32> to vector<32x256xf32>
    %cst = arith.constant dense<0.000000e+00> : vector<32x256xf32>
    %4 = tpu.matmul %0, %3, %cst {dimension_numbers = #tpu.dot_dimension_numbers<[1], [0], [0], [1], [0, 0, 1, 1], [], []>} : vector<32x32xf32>, vector<32x256xf32>, vector<32x256xf32> -> vector<32x256xf32>
    %5 = vector.broadcast %1 : vector<32x1xf32> to vector<32x256xf32>
    %6 = arith.addf %4, %5 : vector<32x256xf32>
    %7 = arith.addf %6, %3 : vector<32x256xf32>
    %c0_6 = arith.constant 0 : index
    %c0_7 = arith.constant 0 : index
    %c0_8 = arith.constant 0 : index
    %8 = vector.load %arg5[%c0_6, %c0_7, %c0_8] : memref<2x32x256xf32, #tpu.memory_space<vmem>>, vector<1x32x256xf32>
    %9 = vector.shape_cast %8 : vector<1x32x256xf32> to vector<32x256xf32>
    %10 = vector.shape_cast %7 : vector<32x256xf32> to vector<1x32x256xf32>
    tpu.vector_store %arg5[%c0_6, %c0_7, %c0_8], %10 {strides = array<i32>} : memref<2x32x256xf32, #tpu.memory_space<vmem>>, vector<1x32x256xf32>,
    %c1 = arith.constant 1 : index
    %c0_9 = arith.constant 0 : index
    %c0_10 = arith.constant 0 : index
    %11 = vector.load %arg2[%c1, %c0_9, %c0_10] : memref<2x32x256xf32, #tpu.memory_space<vmem>>, vector<1x32x256xf32>
    %12 = vector.shape_cast %11 : vector<1x32x256xf32> to vector<32x256xf32>
    %cst_11 = arith.constant dense<0.000000e+00> : vector<32x256xf32>
    %13 = tpu.matmul %0, %12, %cst_11 {dimension_numbers = #tpu.dot_dimension_numbers<[1], [0], [0], [1], [0, 0, 1, 1], [], []>} : vector<32x32xf32>, vector<32x256xf32>, vector<32x256xf32> -> vector<32x256xf32>
    %14 = vector.broadcast %1 : vector<32x1xf32> to vector<32x256xf32>
    %15 = arith.addf %13, %14 : vector<32x256xf32>
    %16 = arith.addf %15, %12 : vector<32x256xf32>
    %c1_12 = arith.constant 1 : index
    %c0_13 = arith.constant 0 : index
    %c0_14 = arith.constant 0 : index
    %17 = vector.load %arg5[%c1_12, %c0_13, %c0_14] : memref<2x32x256xf32, #tpu.memory_space<vmem>>, vector<1x32x256xf32>
    %18 = vector.shape_cast %17 : vector<1x32x256xf32> to vector<32x256xf32>
    %19 = vector.shape_cast %16 : vector<32x256xf32> to vector<1x32x256xf32>
    tpu.vector_store %arg5[%c1_12, %c0_13, %c0_14], %19 {strides = array<i32>} : memref<2x32x256xf32, #tpu.memory_space<vmem>>, vector<1x32x256xf32>,
    return
  }
  func.func @transform_0(%arg0: i32, %arg1: i32) -> (i32, i32, i32) {
    %c0_i32 = arith.constant 0 : i32
    %c0_i32_0 = arith.constant 0 : i32
    return %arg0, %c0_i32, %arg1 : i32, i32, i32
  }
  func.func @transform_1(%arg0: i32, %arg1: i32) -> (i32, i32) {
    %c0_i32 = arith.constant 0 : i32
    %c0_i32_0 = arith.constant 0 : i32
    %c0_i32_1 = arith.constant 0 : i32
    return %c0_i32, %c0_i32_0 : i32, i32
  }
  func.func @transform_2(%arg0: i32, %arg1: i32) -> (i32, i32) {
    %c0_i32 = arith.constant 0 : i32
    %c0_i32_0 = arith.constant 0 : i32
    %c0_i32_1 = arith.constant 0 : i32
    return %c0_i32, %c0_i32_0 : i32, i32
  }
  func.func @transform_3(%arg0: i32, %arg1: i32) -> (i32, i32, i32) {
    %c0_i32 = arith.constant 0 : i32
    %c0_i32_0 = arith.constant 0 : i32
    return %arg0, %c0_i32, %arg1 : i32, i32, i32
  }
}

</mosaic_0001>

<bundles_post_ra>
// kernel: tpu_custom_call.1
= control target key start
LH: loop header
LB: loop body
LE: loop exit
PB: predicated region body
PF: predicated region fallthrough
CT: control target
= control target key end

     0   :  { %8 = vsyncpa [#allocation3], 0  ;;  %s543_s0 = inlined_call_operand.hbm [shape: f32[2,32,256], index: 0, kind: input, shape index: {}]   ;;  %s544_s1 = inlined_call_operand.vmem [shape: f32[32,32], index: 1, kind: input, shape index: {}]   ;;  %s545_s2 = inlined_call_operand.vmem [shape: f32[32,1], index: 2, kind: input, shape index: {}]   ;;  %s546_s3 = inlined_call_operand.hbm [shape: f32[2,32,256], index: 3, kind: output, shape index: {}]  }
   0x1   :  { %9 = vsyncpa [#allocation4], 0  ;;  %s395_s12 = smov [#allocation2]   ;;  %s347_s16 = scalar_lea.hbm %s543_s0, 2048 }
   0x2   :  { %s15_s13 = sshll.u32 %s395_s12, 4  ;;  %p348_p0 = scmp.ne.s32.totalorder %s543_s0, %s347_s16  ;;  %s16_s13 = int_to_ptr.vmem [resolvable:$true] %s15_s13 }
   0x3   :  { %p351_p1 = scmp.lt.u32.totalorder %s347_s16, %s543_s0 }
   0x5   :  { %p353_p2 = pnand %p351_p1, %p348_p0 }
   0x7   :  { %356 = shalt.err (!%p353_p2)
}
   0x8   :  { %s357_s21 = scalar_lea.vmem %s16_s13, 2048  ;;  %p362_p4 = scmp.lt.s32.totalorder %s16_s13, %s16_s13 }
   0x9   :  { %p358_p3 = scmp.ne.s32.totalorder %s16_s13, %s357_s21  ;;  %p363_p5 = scmp.lt.s32.totalorder %s357_s21, %s357_s21 }
   0xb   :  { %p364_p6 = por %p363_p5, %p362_p4 }
   0xd   :  { %p365_p7 = pnand %p364_p6, %p358_p3 }
   0xf   :  { %368 = shalt.err (!%p365_p7)
}
  0x10   :  { %s396_s22 = smov 256   ;;  %s397_s23 = smov 16  }
  0x11   :  { %21 = dma.hbm_to_vmem [thread:$0]  %s543_s0, 2048, %s16_s13, [#allocation3], %s396_s22, %s396_s22, %s397_s23  }
  0x12   :  { %391 = dma.done.wait [#allocation3], 2048  }
  0x13   :  { %392 = vsyncadd [#allocation3], 4294965248  ;;  %v398_v0 = vmov 0.0   ;;  %v399_v1 = vmov 0   ;;  %v436_v2 = vld [vmem:[#allocation2 + $0x8] sm:$0xff]  ;;  %v438_v3 = vld [vmem:[#allocation2 + $0x18] sm:$0xff] }
  0x14   :  { %142 = vmatprep.mubr.f32.mxu0 %v398_v0  ;;  %256 = vmatprep.mubr.f32.mxu1 %v398_v0  ;;  %v440_v4 = vld [vmem:[#allocation2 + $0x48] sm:$0xff]  ;;  %v323_v5 = vpack.c.bf16 %v438_v3, %v436_v2  ;;  %v444_v6 = vld [vmem:[#allocation2 + $0x58] sm:$0xff]  ;;  %v446_v7 = vld [vmem:[#allocation2] sm:$0xff]  ;;  %vm65_vm0 = vcmask 261120  }
  0x15   :  { %345 = vset.pattern.permute.xlu0 %v399_v1  ;;  %346 = vset.pattern.permute.xlu1 %v399_v1  ;;  %v448_v8 = vld [vmem:[#allocation2 + $0x10] sm:$0xff]  ;;  %v331_v9 = vpack.c.bf16 %v444_v6, %v440_v4  ;;  %v184_v11 = vld [vmem:[#allocation2 + $0x40] sm:$0xff]  ;;  %v456_v13 = vld [vmem:[#allocation2 + $0x28] sm:$0xff] }
  0x16   :  { %v325_v10 = vpack.c.bf16 %v448_v8, %v446_v7  ;;  %v454_v12 = vld [vmem:[#allocation2 + $0x50] sm:$0xff]  ;;  %324 = vmatprep.subr.bf16.mxu0 %v323_v5  ;;  %v459_v15 = vld [vmem:[#allocation2 + $0x38] sm:$0xff]  ;;  %v461_v16 = vld [vmem:[#allocation2 + $0x68] sm:$0xff] }
  0x17   :  { %v333_v14 = vpack.c.bf16 %v454_v12, %v184_v11  ;;  %v463_v17 = vld [vmem:[#allocation2 + $0x78] sm:$0xff]  ;;  %332 = vmatprep.subr.bf16.mxu1 %v331_v9  ;;  %v327_v18 = vpack.c.bf16 %v459_v15, %v456_v13  ;;  %v469_v20 = vld [vmem:[#allocation2 + $0x20] sm:$0xff]  ;;  %v471_v21 = vld [vmem:[#allocation2 + $0x30] sm:$0xff] }
  0x18   :  { %326 = vmatpush1.bf16.msra.mxu0 %v325_v10  ;;  %v335_v19 = vpack.c.bf16 %v463_v17, %v461_v16  ;;  %v473_v22 = vld [vmem:[#allocation2 + $0x60] sm:$0xff]  ;;  %v329_v23 = vpack.c.bf16 %v471_v21, %v469_v20  ;;  %v477_v24 = vld [vmem:[#allocation2 + $0x70] sm:$0xff]  ;;  %v34_v29 = vld [vmem:[%s545_s2 + $0x8] sm:$0xff] }
  0x19   :  { %334 = vmatpush1.bf16.msra.mxu1 %v333_v14  ;;  %328 = vmatprep.subr.bf16.mxu0 %v327_v18  ;;  %v337_v25 = vpack.c.bf16 %v477_v24, %v473_v22  ;;  %v33_v26 = vld [vmem:[%s545_s2] sm:$0xff]  ;;  %v35_v27 = vld [vmem:[%s545_s2 + $0x10] sm:$0xff]  ;;  %v36_v30 = vld [vmem:[%s545_s2 + $0x18] sm:$0xff] }
  0x1a   :  { %336 = vmatprep.subr.bf16.mxu1 %v335_v19  ;;  %47 = vperm.xlu0 %345, %v33_v26   ;;  %v29_v28 = vld [vmem:[%s544_s1] sm:$0xff]  ;;  %v30_v31 = vld [vmem:[%s544_s1 + $0x8] sm:$0xff]  ;;  %v31_v32 = vld [vmem:[%s544_s1 + $0x10] sm:$0xff] }
  0x1b   :  { %57 = vperm.xlu1 %346, %v35_v27   ;;  %v32_v33 = vld [vmem:[%s544_s1 + $0x18] sm:$0xff]  ;;  %s400_s1 = smov [#allocation5]  }
  0x1c   :  { %330 = vmatpush1.bf16.msra.mxu0 %v329_v23  ;;  %s303_s13 = sshll.u32 %s400_s1, 4  ;;  %s304_s13 = int_to_ptr.vmem [resolvable:$true] %s303_s13 }
  0x1d   :  { %338 = vmatpush1.bf16.msra.mxu1 %v337_v25  ;;  %s369_s14 = scalar_lea.vmem %s304_s13, 2048  ;;  %p374_p9 = scmp.lt.s32.totalorder %s304_s13, %s304_s13 }
  0x1e   :  { %52 = vperm.xlu0 %345, %v34_v29   ;;  %p370_p8 = scmp.ne.s32.totalorder %s304_s13, %s369_s14  ;;  %p375_p10 = scmp.lt.s32.totalorder %s369_s14, %s369_s14 }
  0x1f   :  { %315 = vmatmul.mubr.msk.f32.vlgmr.msra.gmra.mrb[0].mxu0 %vm65_vm0, %v29_v28  ;;  %62 = vperm.xlu1 %346, %v36_v30  }
  0x20   :  { %319 = vmatmul.mubr.msk.f32.vlgmr.msra.gmra.mrb[0].mxu1 %vm65_vm0, %v29_v28  ;;  %148 = vmatprep.mubr.f32.mxu0 %v398_v0  ;;  %p376_p11 = por %p375_p10, %p374_p9 }
  0x21   :  { %262 = vmatprep.mubr.f32.mxu1 %v398_v0 }
  0x22   :  { %p377_p12 = pnand %p376_p11, %p370_p8 }
  0x23   :  { %316 = vmatmul.mubr.msk.f32.gmra.mrb[2].mxu0 %vm65_vm0, %v30_v31 }
  0x24   :  { %320 = vmatmul.mubr.msk.f32.gmra.mrb[2].mxu1 %vm65_vm0, %v30_v31  ;;  %154 = vmatprep.mubr.f32.mxu0 %v398_v0 }
  0x25   :  { %268 = vmatprep.mubr.f32.mxu1 %v398_v0 }
  0x27   :  { %317 = vmatmul.mubr.msk.f32.gmra.mrb[4].mxu0 %vm65_vm0, %v31_v32 }
  0x28   :  { %321 = vmatmul.mubr.msk.f32.gmra.mrb[4].mxu1 %vm65_vm0, %v31_v32  ;;  %160 = vmatprep.mubr.f32.mxu0 %v398_v0 }
  0x29   :  { %274 = vmatprep.mubr.f32.mxu1 %v398_v0 }
  0x2b   :  { %318 = vmatmul.mubr.msk.f32.gmra.mrb[6].mxu0 %vm65_vm0, %v32_v33 }
  0x2c   :  { %322 = vmatmul.mubr.msk.f32.gmra.mrb[6].mxu1 %vm65_vm0, %v32_v33 }
  0x99   :  { %v48_v34 = vpop.permute.xlu0 %47 }
  0x9a   :  { %v58_v53 = vpop.permute.xlu1 %57 }
  0x9d   :  { %v53_v42 = vpop.permute.xlu0 %52 }
  0x9e   :  { %v63_v9 = vpop.permute.xlu1 %62 }
  0xf2   :  { %v144_v35 = vpop.f32.mrb[0].mxu0 }
  0xf3   :  { %v145_v36 = vadd.f32 %v144_v35, %v48_v34  ;;  %v258_v37 = vpop.f32.mrb[0].mxu1  ;;  %v146_v38 = vpop.f32.mrb[1].mxu0 }
  0xf4   :  { %v259_v39 = vadd.f32 %v258_v37, %v48_v34  ;;  %v147_v40 = vadd.f32 %v146_v38, %v48_v34  ;;  %v260_v41 = vpop.f32.mrb[1].mxu1 }
  0xf5   :  { %v167_v43 = vadd.f32 %v145_v36, %v446_v7  ;;  %v261_v44 = vadd.f32 %v260_v41, %v48_v34 }
  0xf6   :  { %v281_v45 = vadd.f32 %v259_v39, %v184_v11  ;;  %v168_v46 = vadd.f32 %v147_v40, %v436_v2  ;;  %v150_v47 = vpop.f32.mrb[2].mxu0 }
  0xf7   :  { %175 = vst [vmem:[#allocation5] sm:$0xff] %v167_v43  ;;  %v282_v48 = vadd.f32 %v261_v44, %v440_v4  ;;  %v151_v49 = vadd.f32 %v150_v47, %v53_v42  ;;  %v264_v50 = vpop.f32.mrb[2].mxu1  ;;  %v152_v51 = vpop.f32.mrb[3].mxu0 }
  0xf8   :  { %290 = vst [vmem:[#allocation5 + $0x40] sm:$0xff] %v281_v45  ;;  %176 = vst [vmem:[#allocation5 + $0x8] sm:$0xff] %v168_v46  ;;  %v265_v52 = vadd.f32 %v264_v50, %v53_v42  ;;  %v153_v54 = vadd.f32 %v152_v51, %v53_v42  ;;  %v266_v55 = vpop.f32.mrb[3].mxu1 }
  0xf9   :  { %291 = vst [vmem:[#allocation5 + $0x48] sm:$0xff] %v282_v48  ;;  %v169_v56 = vadd.f32 %v151_v49, %v448_v8  ;;  %v267_v57 = vadd.f32 %v266_v55, %v53_v42 }
  0xfa   :  { %v283_v58 = vadd.f32 %v265_v52, %v454_v12  ;;  %v170_v59 = vadd.f32 %v153_v54, %v438_v3  ;;  %v156_v60 = vpop.f32.mrb[4].mxu0 }
  0xfb   :  { %177 = vst [vmem:[#allocation5 + $0x10] sm:$0xff] %v169_v56  ;;  %v284_v61 = vadd.f32 %v267_v57, %v444_v6  ;;  %v157_v62 = vadd.f32 %v156_v60, %v58_v53  ;;  %v270_v63 = vpop.f32.mrb[4].mxu1  ;;  %v158_v0 = vpop.f32.mrb[5].mxu0 }
  0xfc   :  { %292 = vst [vmem:[#allocation5 + $0x50] sm:$0xff] %v283_v58  ;;  %178 = vst [vmem:[#allocation5 + $0x18] sm:$0xff] %v170_v59  ;;  %v271_v1 = vadd.f32 %v270_v63, %v58_v53  ;;  %v159_v2 = vadd.f32 %v158_v0, %v58_v53  ;;  %v272_v4 = vpop.f32.mrb[5].mxu1 }
  0xfd   :  { %293 = vst [vmem:[#allocation5 + $0x58] sm:$0xff] %v284_v61  ;;  %v171_v5 = vadd.f32 %v157_v62, %v469_v20  ;;  %v273_v7 = vadd.f32 %v272_v4, %v58_v53 }
  0xfe   :  { %v285_v8 = vadd.f32 %v271_v1, %v473_v22  ;;  %v172_v3 = vadd.f32 %v159_v2, %v456_v13  ;;  %v162_v10 = vpop.f32.mrb[6].mxu0 }
  0xff   :  { %179 = vst [vmem:[#allocation5 + $0x20] sm:$0xff] %v171_v5  ;;  %v286_v6 = vadd.f32 %v273_v7, %v461_v16  ;;  %v163_v11 = vadd.f32 %v162_v10, %v63_v9  ;;  %v276_v12 = vpop.f32.mrb[6].mxu1  ;;  %v164_v14 = vpop.f32.mrb[7].mxu0 }
 0x100   :  { %294 = vst [vmem:[#allocation5 + $0x60] sm:$0xff] %v285_v8  ;;  %180 = vst [vmem:[#allocation5 + $0x28] sm:$0xff] %v172_v3  ;;  %v277_v18 = vadd.f32 %v276_v12, %v63_v9  ;;  %v165_v19 = vadd.f32 %v164_v14, %v63_v9  ;;  %v278_v23 = vpop.f32.mrb[7].mxu1 }
 0x101   :  { %295 = vst [vmem:[#allocation5 + $0x68] sm:$0xff] %v286_v6  ;;  %v173_v20 = vadd.f32 %v163_v11, %v471_v21  ;;  %v279_v22 = vadd.f32 %v278_v23, %v63_v9 }
 0x102   :  { %v287_v13 = vadd.f32 %v277_v18, %v477_v24  ;;  %v174_v25 = vadd.f32 %v165_v19, %v459_v15 }
 0x103   :  { %181 = vst [vmem:[#allocation5 + $0x30] sm:$0xff] %v173_v20  ;;  %v288_v16 = vadd.f32 %v279_v22, %v463_v17 }
 0x104   :  { %296 = vst [vmem:[#allocation5 + $0x70] sm:$0xff] %v287_v13  ;;  %182 = vst [vmem:[#allocation5 + $0x38] sm:$0xff] %v174_v25 }
 0x105   :  { %297 = vst [vmem:[#allocation5 + $0x78] sm:$0xff] %v288_v16 }
 0x106   :  { %380 = shalt.err (!%p377_p12)
}
 0x107   :  { %s381_s17 = scalar_lea.hbm %s546_s3, 2048 }
 0x108   :  { %p382_p13 = scmp.ne.s32.totalorder %s546_s3, %s381_s17  ;;  %p385_p0 = scmp.lt.u32.totalorder %s381_s17, %s546_s3 }
 0x10a   :  { %p387_p1 = pnand %p385_p0, %p382_p13 }
 0x10c   :  { %390 = shalt.err (!%p387_p1)
}
 0x10d   :  { %309 = dma.vmem_to_hbm [thread:$0]  %s304_s13, 2048, %s546_s3, [#allocation4], %s396_s22, %s396_s22, %s397_s23  }
 0x10e   :  { %393 = dma.done.wait [#allocation4], 2048  }
 0x10f   :  { %394 = vsyncadd [#allocation4], 4294965248 }
 0x110   :  { %313 = vsyncpa [#allocation3], 1 }
 0x111   :  { %314 = vsyncpa [#allocation4], 1 }

</bundles_post_ra>
